<compile_context>
chip_gen: v6e
topology: v6e:2x2x1
jax: 0.10.0
libtpu: 0.0.40
codegen_flags: <defaults>
</compile_context>

<pallas_src>
import functools

import jax
import jax.numpy as jnp
from jax.experimental import pallas as pl
from jax.experimental.pallas import tpu as pltpu

EPS = 1e-5       # nn.BatchNorm2d default
LANES = 128      # TPU lane width


def _pick_row_tile(ho, wo, max_tile_rows=2048):
    """Row-tile height TH: a multiple-of-8 divisor of `ho` (or `ho` itself, which
    is always BlockSpec-legal), as large as possible while keeping TH*Wo matmul
    rows within a modest VMEM budget (and ideally >= 128 rows per MXU push)."""
    cands = [t for t in range(8, ho + 1, 8) if ho % t == 0]
    cands.append(ho)
    fitting = [t for t in cands if t * wo <= max_tile_rows]
    return max(fitting) if fitting else min(cands)


def _conv_tile(xw_ref, w_ref, th, wo, kh):
    """3x3 conv for one (image, row-tile): KH fat MXU matmuls.

    xw_ref: (1, 1, (TH+KH-1)*Wo, KW*C)  kx/c-folded, row-windowed input tile
    w_ref:  (KH, KW*C, OCP)             folded-K weights, OC zero-padded to OCP
    returns (TH*Wo, OCP) f32
    """
    rows = th * wo
    ocp = w_ref.shape[-1]
    acc = jnp.zeros((rows, ocp), jnp.float32)
    for ky in range(kh):
        # Rows [ky*Wo, ky*Wo + TH*Wo) of the flattened window are exactly the
        # (h+ky, w) features needed for output rows (h, w) — contiguous slice,
        # no in-kernel reshape/concat required.
        lhs = xw_ref[0, 0, ky * wo:ky * wo + rows, :]         # (TH*Wo, KW*C)
        acc = acc + jnp.dot(lhs, w_ref[ky],
                            preferred_element_type=jnp.float32)
    return acc


def _conv_stats_kernel(xw_ref, w_ref, st_ref, *, th, wo, kh):
    """Pass 1: per-(image, row-tile) channel sum and centered sum-of-squares."""
    conv = _conv_tile(xw_ref, w_ref, th, wo, kh)              # (TH*Wo, OCP)
    s = jnp.sum(conv, axis=0, keepdims=True)                  # (1, OCP)
    mu = s * (1.0 / (th * wo))
    d = conv - mu
    q = jnp.sum(d * d, axis=0, keepdims=True)                 # (1, OCP)
    st_ref[0, 0, 0:1, :] = s
    st_ref[0, 0, 1:2, :] = q


def _conv_bn_relu_kernel(xw_ref, w_ref, ss_ref, o_ref, *, th, wo, kh, oc):
    """Pass 2: recompute conv, apply folded BN scale/shift + ReLU, store unpadded."""
    conv = _conv_tile(xw_ref, w_ref, th, wo, kh)              # (TH*Wo, OCP)
    y = jnp.maximum(conv * ss_ref[0:1, :] + ss_ref[1:2, :], 0.0)
    o_ref[0, :, :] = y[:, :oc]                                # drop padded chans


def block_forward(x_nchw, w_oihw, bias, gamma, beta, *, padding=1):
    """ReLU(BatchNorm2d(Conv2d(x)))  with training-mode BN.  NCHW in / out.

    `bias` is accepted for API parity with nn.Conv2d but unused: under
    training-mode BatchNorm the batch-mean subtraction cancels it exactly.
    """
    del bias  # mathematically a no-op under training-mode BN
    N, C, H, W = x_nchw.shape
    OC, _, KH, KW = w_oihw.shape

    Hp, Wp = H + 2 * padding, W + 2 * padding
    Ho, Wo = Hp - KH + 1, Wp - KW + 1
    OCP = max(LANES, ((OC + LANES - 1) // LANES) * LANES)
    KWC = KW * C

    TH = _pick_row_tile(Ho, Wo)
    T = Ho // TH
    THK = TH + KH - 1

    # ---------------- layout glue (wrapper-side, pure XLA data movement) -----
    x = jnp.transpose(x_nchw, (0, 2, 3, 1)).astype(jnp.float32)          # NHWC
    xp = jnp.pad(x, ((0, 0), (padding, padding), (padding, padding), (0, 0)))
    # Fold kx taps + channels into the contraction dim:
    #   xkx[n, h, w, kx*C + c] = xp[n, h, w + kx, c]        -> (N, Hp, Wo, KW*C)
    xkx = jnp.concatenate([xp[:, :, kx:kx + Wo, :] for kx in range(KW)], axis=-1)
    # Overlapping row windows, one per row-tile (duplicates only KH-1 rows/tile),
    # flattened so each ky needs just a contiguous row slice in the kernel.
    xwin = jnp.stack([xkx[:, t * TH:t * TH + THK] for t in range(T)], axis=1)
    xwin = xwin.reshape(N, T, THK * Wo, KWC)

    # Weights: (OC, C, KH, KW) -> (KH, KW*C, OCP) folded-K, lane-dense OC pad.
    w = jnp.transpose(w_oihw, (2, 3, 1, 0)).astype(jnp.float32)   # (KH,KW,C,OC)
    w = w.reshape(KH, KWC, OC)
    w = jnp.pad(w, ((0, 0), (0, 0), (0, OCP - OC)))
    g = jnp.pad(gamma.astype(jnp.float32), (0, OCP - OC))
    b = jnp.pad(beta.astype(jnp.float32), (0, OCP - OC))

    cparams = pltpu.CompilerParams(
        dimension_semantics=("parallel", "parallel"),
        vmem_limit_bytes=32 * 1024 * 1024)

    # -------- pass 1: conv (recomputed in pass 2) -> per-tile channel stats --
    stats = pl.pallas_call(
        functools.partial(_conv_stats_kernel, th=TH, wo=Wo, kh=KH),
        out_shape=jax.ShapeDtypeStruct((N, T, 2, OCP), jnp.float32),
        grid=(N, T),
        in_specs=[
            pl.BlockSpec((1, 1, THK * Wo, KWC), lambda n, t: (n, t, 0, 0)),
            pl.BlockSpec((KH, KWC, OCP), lambda n, t: (0, 0, 0)),
        ],
        out_specs=pl.BlockSpec((1, 1, 2, OCP), lambda n, t: (n, t, 0, 0)),
        compiler_params=cparams,
    )(xwin, w)

    # ---- tiny (OCP,) glue: combine per-tile stats, fold BN to scale/shift ---
    m_tile = jnp.float32(TH * Wo)
    M = jnp.float32(N * Ho * Wo)
    s_t = stats[:, :, 0, :]                              # (N, T, OCP)
    q_t = stats[:, :, 1, :]
    mean = jnp.sum(s_t, axis=(0, 1)) / M
    mu_t = s_t / m_tile
    # Grouped (Welford-style) variance combine: robust vs global E[x^2]-mean^2.
    var = (jnp.sum(q_t, axis=(0, 1))
           + m_tile * jnp.sum((mu_t - mean) ** 2, axis=(0, 1))) / M
    var = jnp.maximum(var, 0.0)
    scale = g * jax.lax.rsqrt(var + EPS)                 # gamma * rsqrt(var+eps)
    shift = b - mean * scale                             # beta  - mean * scale
    ss = jnp.stack([scale, shift], axis=0)               # (2, OCP)

    # -------- pass 2: recompute conv, fused BN affine + ReLU, single write ---
    out_flat = pl.pallas_call(
        functools.partial(_conv_bn_relu_kernel, th=TH, wo=Wo, kh=KH, oc=OC),
        out_shape=jax.ShapeDtypeStruct((N, Ho * Wo, OC), jnp.float32),
        grid=(N, T),
        in_specs=[
            pl.BlockSpec((1, 1, THK * Wo, KWC), lambda n, t: (n, t, 0, 0)),
            pl.BlockSpec((KH, KWC, OCP), lambda n, t: (0, 0, 0)),
            pl.BlockSpec((2, OCP), lambda n, t: (0, 0)),
        ],
        out_specs=pl.BlockSpec((1, TH * Wo, OC), lambda n, t: (n, t, 0)),
        compiler_params=cparams,
    )(xwin, w, ss)

    # (N, Ho*Wo, OC) -> NHWC -> NCHW
    out = out_flat.reshape(N, Ho, Wo, OC)
    return jnp.transpose(out, (0, 3, 1, 2))


def reference_forward(x_nchw, w_oihw, bias, gamma, beta, *, padding=1):
    """Pure-JAX reference mirroring PyTorch Block.forward (training-mode BN)."""
    conv = jax.lax.conv_general_dilated(
        x_nchw, w_oihw, window_strides=(1, 1),
        padding=[(padding, padding), (padding, padding)],
        dimension_numbers=("NCHW", "OIHW", "NCHW"))
    conv = conv + bias.reshape(1, -1, 1, 1)
    mean = jnp.mean(conv, axis=(0, 2, 3), keepdims=True)
    var = jnp.mean((conv - mean) ** 2, axis=(0, 2, 3), keepdims=True)
    y = (conv - mean) * jax.lax.rsqrt(var + EPS)
    y = y * gamma.reshape(1, -1, 1, 1) + beta.reshape(1, -1, 1, 1)
    return jnp.maximum(y, 0.0)


if __name__ == "__main__":
    # Small shapes: Block(in_ch=4, out_ch=8), x: (2, 4, 16, 16)
    N, C_IN, H, W = 2, 4, 16, 16
    OC, KH, KW, PAD = 8, 3, 3, 1

    key = jax.random.PRNGKey(0)
    kx, kw, kb = jax.random.split(key, 3)

    x = jax.random.normal(kx, (N, C_IN, H, W), dtype=jnp.float32)

    # Conv2d default init: U(-1/sqrt(fan_in), 1/sqrt(fan_in)), fan_in = C*KH*KW
    fan_in = C_IN * KH * KW
    bound = 1.0 / jnp.sqrt(float(fan_in))
    w_conv = jax.random.uniform(kw, (OC, C_IN, KH, KW),
                                minval=-bound, maxval=bound, dtype=jnp.float32)
    b_conv = jax.random.uniform(kb, (OC,),
                                minval=-bound, maxval=bound, dtype=jnp.float32)
    # BatchNorm2d default init: weight=1, bias=0
    gamma = jnp.ones((OC,), jnp.float32)
    beta = jnp.zeros((OC,), jnp.float32)

    out = jax.block_until_ready(
        block_forward(x, w_conv, b_conv, gamma, beta, padding=PAD))
    assert out.shape == (N, OC, H, W), out.shape

    ref = jax.block_until_ready(
        reference_forward(x, w_conv, b_conv, gamma, beta, padding=PAD))
    max_err = float(jnp.max(jnp.abs(out - ref)))
    assert jnp.allclose(out, ref, atol=1e-3, rtol=1e-3), max_err

    print("KERNEL_OK")
</pallas_src>

<mosaic_0001>
module attributes {stable_mosaic.version = 11 : i64} {
  func.func @_conv_stats_kernel(%arg0: i32, %arg1: i32, %arg2: memref<1x1x288x12xf32, #tpu.memory_space<vmem>>, %arg3: memref<3x12x128xf32, #tpu.memory_space<vmem>>, %arg4: memref<1x1x2x128xf32, #tpu.memory_space<vmem>>) attributes {dimension_semantics = [#tpu.dimension_semantics<parallel>, #tpu.dimension_semantics<parallel>], iteration_bounds = array<i64: 2, 1>, scalar_prefetch = 0 : i64, scratch_operands = 0 : i64, tpu.core_type = #tpu.core_type<tc>, window_params = [{transform_indices = @transform_0, window_bounds = array<i64: 1, 1, 288, 12>}, {pipeline_mode = #tpu.pipeline_mode<synchronous>, transform_indices = @transform_1, window_bounds = array<i64: 3, 12, 128>}, {transform_indices = @transform_2, window_bounds = array<i64: 1, 1, 2, 128>}]} {
    %cst = arith.constant 0.000000e+00 : f32
    %0 = vector.broadcast %cst : f32 to vector<256x128xf32>
    %c0 = arith.constant 0 : index
    %c0_0 = arith.constant 0 : index
    %c0_1 = arith.constant 0 : index
    %c0_2 = arith.constant 0 : index
    %1 = vector.load %arg2[%c0, %c0_0, %c0_1, %c0_2] : memref<1x1x288x12xf32, #tpu.memory_space<vmem>>, vector<1x1x256x12xf32>
    %2 = vector.shape_cast %1 : vector<1x1x256x12xf32> to vector<256x12xf32>
    %c0_3 = arith.constant 0 : index
    %c0_4 = arith.constant 0 : index
    %c0_5 = arith.constant 0 : index
    %3 = vector.load %arg3[%c0_3, %c0_4, %c0_5] : memref<3x12x128xf32, #tpu.memory_space<vmem>>, vector<1x12x128xf32>
    %4 = vector.shape_cast %3 : vector<1x12x128xf32> to vector<12x128xf32>
    %cst_6 = arith.constant dense<0.000000e+00> : vector<256x128xf32>
    %5 = tpu.matmul %2, %4, %cst_6 {dimension_numbers = #tpu.dot_dimension_numbers<[1], [0], [0], [1], [0, 0, 1, 1], [], []>} : vector<256x12xf32>, vector<12x128xf32>, vector<256x128xf32> -> vector<256x128xf32>
    %6 = arith.addf %0, %5 : vector<256x128xf32>
    %c0_7 = arith.constant 0 : index
    %c0_8 = arith.constant 0 : index
    %c16 = arith.constant 16 : index
    %c0_9 = arith.constant 0 : index
    %7 = vector.load %arg2[%c0_7, %c0_8, %c16, %c0_9] : memref<1x1x288x12xf32, #tpu.memory_space<vmem>>, vector<1x1x256x12xf32>
    %8 = vector.shape_cast %7 : vector<1x1x256x12xf32> to vector<256x12xf32>
    %c1 = arith.constant 1 : index
    %c0_10 = arith.constant 0 : index
    %c0_11 = arith.constant 0 : index
    %9 = vector.load %arg3[%c1, %c0_10, %c0_11] : memref<3x12x128xf32, #tpu.memory_space<vmem>>, vector<1x12x128xf32>
    %10 = vector.shape_cast %9 : vector<1x12x128xf32> to vector<12x128xf32>
    %cst_12 = arith.constant dense<0.000000e+00> : vector<256x128xf32>
    %11 = tpu.matmul %8, %10, %cst_12 {dimension_numbers = #tpu.dot_dimension_numbers<[1], [0], [0], [1], [0, 0, 1, 1], [], []>} : vector<256x12xf32>, vector<12x128xf32>, vector<256x128xf32> -> vector<256x128xf32>
    %12 = arith.addf %6, %11 : vector<256x128xf32>
    %c0_13 = arith.constant 0 : index
    %c0_14 = arith.constant 0 : index
    %c32 = arith.constant 32 : index
    %c0_15 = arith.constant 0 : index
    %13 = vector.load %arg2[%c0_13, %c0_14, %c32, %c0_15] : memref<1x1x288x12xf32, #tpu.memory_space<vmem>>, vector<1x1x256x12xf32>
    %14 = vector.shape_cast %13 : vector<1x1x256x12xf32> to vector<256x12xf32>
    %c2 = arith.constant 2 : index
    %c0_16 = arith.constant 0 : index
    %c0_17 = arith.constant 0 : index
    %15 = vector.load %arg3[%c2, %c0_16, %c0_17] : memref<3x12x128xf32, #tpu.memory_space<vmem>>, vector<1x12x128xf32>
    %16 = vector.shape_cast %15 : vector<1x12x128xf32> to vector<12x128xf32>
    %cst_18 = arith.constant dense<0.000000e+00> : vector<256x128xf32>
    %17 = tpu.matmul %14, %16, %cst_18 {dimension_numbers = #tpu.dot_dimension_numbers<[1], [0], [0], [1], [0, 0, 1, 1], [], []>} : vector<256x12xf32>, vector<12x128xf32>, vector<256x128xf32> -> vector<256x128xf32>
    %18 = arith.addf %12, %17 : vector<256x128xf32>
    %cst_19 = arith.constant dense<0.000000e+00> : vector<128xf32>
    %19 = vector.multi_reduction <add>, %18, %cst_19 [0] : vector<256x128xf32> to vector<128xf32>
    %20 = vector.shape_cast %19 : vector<128xf32> to vector<1x128xf32>
    %cst_20 = arith.constant 3.906250e-03 : f32
    %21 = vector.broadcast %cst_20 : f32 to vector<1x128xf32>
    %22 = arith.mulf %20, %21 : vector<1x128xf32>
    %23 = vector.broadcast %22 : vector<1x128xf32> to vector<256x128xf32>
    %24 = arith.subf %18, %23 : vector<256x128xf32>
    %25 = arith.mulf %24, %24 : vector<256x128xf32>
    %cst_21 = arith.constant dense<0.000000e+00> : vector<128xf32>
    %26 = vector.multi_reduction <add>, %25, %cst_21 [0] : vector<256x128xf32> to vector<128xf32>
    %27 = vector.shape_cast %26 : vector<128xf32> to vector<1x128xf32>
    %c0_22 = arith.constant 0 : index
    %c0_23 = arith.constant 0 : index
    %c0_24 = arith.constant 0 : index
    %c0_25 = arith.constant 0 : index
    %28 = vector.load %arg4[%c0_22, %c0_23, %c0_24, %c0_25] : memref<1x1x2x128xf32, #tpu.memory_space<vmem>>, vector<1x1x1x128xf32>
    %29 = vector.shape_cast %28 : vector<1x1x1x128xf32> to vector<1x128xf32>
    %30 = vector.shape_cast %20 : vector<1x128xf32> to vector<1x1x1x128xf32>
    tpu.vector_store %arg4[%c0_22, %c0_23, %c0_24, %c0_25], %30 {strides = array<i32>} : memref<1x1x2x128xf32, #tpu.memory_space<vmem>>, vector<1x1x1x128xf32>,
    %c0_26 = arith.constant 0 : index
    %c0_27 = arith.constant 0 : index
    %c1_28 = arith.constant 1 : index
    %c0_29 = arith.constant 0 : index
    %31 = vector.load %arg4[%c0_26, %c0_27, %c1_28, %c0_29] : memref<1x1x2x128xf32, #tpu.memory_space<vmem>>, vector<1x1x1x128xf32>
    %32 = vector.shape_cast %31 : vector<1x1x1x128xf32> to vector<1x128xf32>
    %33 = vector.shape_cast %27 : vector<1x128xf32> to vector<1x1x1x128xf32>
    tpu.vector_store %arg4[%c0_26, %c0_27, %c1_28, %c0_29], %33 {strides = array<i32>} : memref<1x1x2x128xf32, #tpu.memory_space<vmem>>, vector<1x1x1x128xf32>,
    return
  }
  func.func @transform_0(%arg0: i32, %arg1: i32) -> (i32, i32, i32, i32) {
    %c0_i32 = arith.constant 0 : i32
    %c0_i32_0 = arith.constant 0 : i32
    %c0_i32_1 = arith.constant 0 : i32
    return %arg0, %arg1, %c0_i32, %c0_i32_0 : i32, i32, i32, i32
  }
  func.func @transform_1(%arg0: i32, %arg1: i32) -> (i32, i32, i32) {
    %c0_i32 = arith.constant 0 : i32
    %c0_i32_0 = arith.constant 0 : i32
    %c0_i32_1 = arith.constant 0 : i32
    %c0_i32_2 = arith.constant 0 : i32
    return %c0_i32, %c0_i32_0, %c0_i32_1 : i32, i32, i32
  }
  func.func @transform_2(%arg0: i32, %arg1: i32) -> (i32, i32, i32, i32) {
    %c0_i32 = arith.constant 0 : i32
    %c0_i32_0 = arith.constant 0 : i32
    %c0_i32_1 = arith.constant 0 : i32
    return %arg0, %arg1, %c0_i32, %c0_i32_0 : i32, i32, i32, i32
  }
}

</mosaic_0001>

<bundles_post_ra>
// kernel: tpu_custom_call.1
= control target key start
LH: loop header
LB: loop body
LE: loop exit
PB: predicated region body
PF: predicated region fallthrough
CT: control target
= control target key end

     0   :  { %7 = vsyncpa [#allocation3], 0  ;;  %s2478_s0 = inlined_call_operand.vmem [shape: f32[2,1,288,12], index: 0, kind: input, shape index: {}]   ;;  %s2479_s1 = inlined_call_operand.vmem [shape: f32[3,12,128], index: 1, kind: input, shape index: {}]   ;;  %s2480_s2 = inlined_call_operand.hbm [shape: f32[2,1,2,128], index: 2, kind: output, shape index: {}]  }
   0x1   :  { %9 = vsyncpa [#allocation3 + $0x1], 0  ;;  %s1919_s9 = smov 0   ;;  %s1921_s10 = smov 0  }
   0x2   :  { %s1923_s11 = smov 0   ;;  %s1925_s12 = smov 0  }
   0x3   :  { %s1927_s13 = smov 0   ;;  %s1929_s14 = smov 0  }
   0x4 LB: > { %s1393_s15 = sadd.s32 4294967295, %s1901_s14   ;;  %s1394_s16 = sadd.s32 4294967294, %s1901_s14   ;;  %s1901_s14 = sphi %s1929_s14, %s15_s14   ;;  %s1897_s13 = sphi %s1927_s13, %s2487_s13   ;;  %s1893_s12 = sphi %s1925_s12, %s2486_s12   ;;  %s1889_s11 = sphi %s1923_s11, %s2485_s11   ;;  %s1885_s10 = sphi %s1921_s10, %s2484_s10   ;;  %s1881_s9 = sphi %s1919_s9, %s2483_s9  }
   0x5   : > { %s27_s17 = sadd.s32 1, %s1897_s13  ;;  %s85_s18 = sadd.s32 1, %s1889_s11 }
   0x6   : > { %p29_p0 = scmp.ge.s32.totalorder %s27_s17, 2  ;;  %p95_p1 = scmp.ne.s32.totalorder %s1889_s11, %s1885_s10 }
   0x7   : > { %p96_p2 = scmp.eq.s32.totalorder %s1393_s15, 1  ;;  %p101_p3 = scmp.ne.s32.totalorder %s1885_s10, %s1881_s9 }
   0x8   : > { %s2489_s17 = smov (%p29_p0, %s27_s17), 0  ;;  %p102_p5 = scmp.eq.s32.totalorder %s1394_s16, 1 }
   0x9   : > { %p1959_p4 = por %p96_p2, %p95_p1  ;;  %s80_s20 = ssub.s32 %s1897_s13, %s2489_s17 }
   0xa   : > { %p1397_p6 = scmp.ge.s32.totalorder %s1901_s14, 1  ;;  %p83_p7 = scmp.eq.s32.totalorder %s80_s20, 0 }
   0xb   : > { %p1966_p8 = por %p102_p5, %p101_p3  ;;  %p135_p9 = scmp.lt.s32.totalorder %s1901_s14, 3 }
   0xc   : > { %s1972_s22 = scalar_select %p83_p7, %s1889_s11, %s85_s18  }
   0xd   : > { %p136_p10 = pnand %p1397_p6, %p135_p9 }
   0xe   : > { %p161_p11 = scmp.lt.s32.totalorder (!%p136_p10), %s1893_s12, 1  ;;  %s158_s20 = sand.u32 (!%p136_p10), 1, %s1885_s10  }
   0xf   : > { %139 = sbr.rel (%p136_p10) target bundleno = 434 (0x1b2), region = 28  ;;  %s1398_s23 = sshll.u32 (!%p136_p10), %s158_s20, 1 }
  0x10   : > { %s2381_s24 = scalar_lea.vmem (!%p136_p10), [#allocation2], %s1398_s23  ;;  %s1504_s25 = sshll.u32 (!%p136_p10), %s1893_s12, 5 }
  0x11   : > { %s1316_s26 = sshll.u32 (!%p136_p10), %s2381_s24, 4  ;;  %s1314_s29 = scalar_lea.hbm (!%p136_p10), %s2480_s2, %s1504_s25  ;;  %s1317_s26 = int_to_ptr.vmem [resolvable:$true] %s1316_s26 }
  0x12   : > { %s1302_s30 = scalar_lea.sflag (!%p136_p10), [#allocation3], %s158_s20  ;;  %s1825_s3 = scalar_lea.vmem (!%p136_p10), %s1317_s26, 32 }
  0x13   : > { %p1826_p12 = scmp.ne.s32.totalorder (!%p136_p10), %s1317_s26, %s1825_s3 }
  0x14   : > { %v1401_v0 = vld [vmem:[%s2479_s1 + $0x18] sm:$0xf]  ;;  %vm306_vm0 = vcmask 1043456   ;;  %v1400_v1 = vld [vmem:[%s2479_s1 + $0x10] sm:$0xff]  ;;  %s162_s27 = scalar_select %p161_p11, %s1893_s12, 1  ;;  %vm209_vm1 = vcmask 97280  }
  0x15   : > { %1765 = vmatprep.subr.msk.mxu1 %vm306_vm0, %v1401_v0  ;;  %1609 = vmatprep.subr.msk.mxu0 %vm306_vm0, %v1401_v0  ;;  %v203_v2 = vld [vmem:[%s2479_s1 + $0x8] sm:$0xf]  ;;  %v202_v10 = vld [vmem:[%s2479_s1] sm:$0xff]  ;;  %p1827_p13 = pnand %p1826_p12, %p1959_p4 }
  0x16   : > { %1767 = vmatpush3.msk.msra.mxu1 %vm306_vm0, %v1401_v0  ;;  %1610 = vmatpush3.msk.msra.mxu0 %vm306_vm0, %v1401_v0  ;;  %v1469_v3 = vld [vmem:[%s2479_s1 + $0x28] sm:$0xf]  ;;  %s1769_s4 = smul.u32 288, %s162_s27  ;;  %v1468_v11 = vld [vmem:[%s2479_s1 + $0x20] sm:$0xff] }
  0x17   : > { %1766 = vmatprep.subr.mxu1 %v1400_v1  ;;  %1611 = vmatprep.subr.mxu0 %v1400_v1  ;;  %p1828_p0 = pneg %p1827_p13 }
  0x18   : > { %1768 = vmatpush3.msra.mxu1 %v1400_v1  ;;  %1612 = vmatpush3.msra.mxu0 %v1400_v1  ;;  %s1997_s7 = scalar_lea.vmem %s2478_s0, %s1769_s4  ;;  %s1903_s4 = smov [#allocation2]  }
  0x19   : > { %1661 = vmatprep.subr.msk.mxu1 %vm306_vm0, %v203_v2  ;;  %1713 = vmatprep.subr.msk.mxu0 %vm306_vm0, %v1469_v3  ;;  %v2000_v4 = vld [vmem:[%s1997_s7 + $0x10] sm:$0xff]  ;;  %v2006_v6 = vld [vmem:[%s1997_s7 + $0x18] sm:$0xff]  ;;  %v2016_v8 = vld [vmem:[%s1997_s7 + $0x20] sm:$0xff]  ;;  %s1829_s5 = sshll.u32 %s1903_s4, 4  ;;  %s1830_s5 = int_to_ptr.vmem [resolvable:$false] %s1829_s5 }
  0x1a   : > { %v2003_v5 = vld [vmem:[%s1997_s7 + $0x90] sm:$0xff]  ;;  %1613 = vmatprep.mubr.msk.f32.mxu0 %vm209_vm1, %v2000_v4  ;;  %v2013_v7 = vld [vmem:[%s1997_s7 + $0x98] sm:$0xff]  ;;  %v2019_v9 = vld [vmem:[%s1997_s7 + $0xa0] sm:$0xff]  ;;  %s1831_s12 = scalar_lea.vmem %s1830_s5, 64  ;;  %p1832_p1 = scmp.lt.s32.totalorder %s1317_s26, %s1830_s5 }
  0x1b   : > { %1637 = vmatprep.mubr.msk.f32.mxu1 %vm209_vm1, %v2003_v5  ;;  %1614 = vmatmul.mubr.msk.f32.vlgmr.msra.gmra.mxu0 %vm209_vm1, %v2006_v6  ;;  %v2034_v12 = vld [vmem:[%s1997_s7 + $0x28] sm:$0xff]  ;;  %v2044_v14 = vld [vmem:[%s1997_s7 + $0x30] sm:$0xff]  ;;  %v177_v16 = vld [vmem:[%s1997_s7 + $0x38] sm:$0xff]  ;;  %p1833_p2 = scmp.lt.s32.totalorder %s1831_s12, %s1825_s3 }
  0x1c   : > { %1638 = vmatmul.mubr.msk.f32.vlgmr.msra.gmra.mxu1 %vm209_vm1, %v2013_v7  ;;  %1714 = vmatpush3.msk.msra.mxu0 %vm306_vm0, %v1469_v3  ;;  %v2037_v13 = vld [vmem:[%s1997_s7 + $0xa8] sm:$0xff]  ;;  %v2047_v15 = vld [vmem:[%s1997_s7 + $0xb0] sm:$0xff]  ;;  %v2059_v17 = vld [vmem:[%s1997_s7 + $0xb8] sm:$0xff] }
  0x1d   : > { %1662 = vmatpush3.msk.msra.mxu1 %vm306_vm0, %v203_v2  ;;  %1616 = vmatprep.mubr.msk.f32.mxu0 %vm209_vm1, %v2016_v8  ;;  %v178_v18 = vld [vmem:[%s1997_s7 + $0x40] sm:$0xff]  ;;  %v179_v20 = vld [vmem:[%s1997_s7 + $0x48] sm:$0xff]  ;;  %v180_v22 = vld [vmem:[%s1997_s7 + $0x50] sm:$0xff]  ;;  %p1834_p3 = por %p1833_p2, %p1832_p1 }
  0x1e   : > { %1640 = vmatprep.mubr.msk.f32.mxu1 %vm209_vm1, %v2019_v9  ;;  %1663 = vmatprep.subr.mxu1 %v202_v10  ;;  %v2063_v19 = vld [vmem:[%s1997_s7 + $0xc0] sm:$0xff]  ;;  %v2073_v21 = vld [vmem:[%s1997_s7 + $0xc8] sm:$0xff]  ;;  %v2077_v23 = vld [vmem:[%s1997_s7 + $0xd0] sm:$0xff] }
  0x1f   : > { %1715 = vmatprep.subr.mxu0 %v1468_v11  ;;  %1617 = vmatmul.mubr.msk.f32.gmra.mxu0 %vm209_vm1, %v2034_v12  ;;  %v181_v24 = vld [vmem:[%s1997_s7 + $0x58] sm:$0xff]  ;;  %v182_v26 = vld [vmem:[%s1997_s7 + $0x60] sm:$0xff]  ;;  %v183_v28 = vld [vmem:[%s1997_s7 + $0x68] sm:$0xff]  ;;  %p1835_p5 = pnand %p1834_p3, %p1828_p0 }
  0x20   : > { %1641 = vmatmul.mubr.msk.f32.gmra.mxu1 %vm209_vm1, %v2037_v13  ;;  %1619 = vmatprep.mubr.msk.f32.mxu0 %vm209_vm1, %v2044_v14  ;;  %v2087_v25 = vld [vmem:[%s1997_s7 + $0xd8] sm:$0xff]  ;;  %v2091_v27 = vld [vmem:[%s1997_s7 + $0xe0] sm:$0xff]  ;;  %v2101_v29 = vld [vmem:[%s1997_s7 + $0xe8] sm:$0xff] }
  0x21   : > { %1643 = vmatprep.mubr.msk.f32.mxu1 %vm209_vm1, %v2047_v15  ;;  %1664 = vmatpush3.msra.mxu1 %v202_v10  ;;  %v184_v30 = vld [vmem:[%s1997_s7 + $0x70] sm:$0xff]  ;;  %v185_v32 = vld [vmem:[%s1997_s7 + $0x78] sm:$0xff]  ;;  %v186_v34 = vld [vmem:[%s1997_s7 + $0x80] sm:$0xff] }
  0x22   : > { %1716 = vmatpush3.msra.mxu0 %v1468_v11  ;;  %v2105_v31 = vld [vmem:[%s1997_s7 + $0xf0] sm:$0xff]  ;;  %v2115_v33 = vld [vmem:[%s1997_s7 + $0xf8] sm:$0xff]  ;;  %v2119_v35 = vld [vmem:[%s1997_s7 + $0x100] sm:$0xff] }
  0x23   : > { %1620 = vmatmul.mubr.msk.f32.gmra.mxu0 %vm209_vm1, %v177_v16  ;;  %v187_v36 = vld [vmem:[%s1997_s7 + $0x88] sm:$0xff]  ;;  %v170_v38 = vld [vmem:[%s1997_s7] sm:$0xff]  ;;  %v799_v40 = vld [vmem:[%s1997_s7 + $0x110] sm:$0xff] }
  0x24   : > { %1644 = vmatmul.mubr.msk.f32.gmra.mxu1 %vm209_vm1, %v2059_v17  ;;  %1622 = vmatprep.mubr.msk.f32.mxu0 %vm209_vm1, %v178_v18  ;;  %v2129_v37 = vld [vmem:[%s1997_s7 + $0x108] sm:$0xff]  ;;  %v800_v41 = vld [vmem:[%s1997_s7 + $0x118] sm:$0xff] }
  0x25   : > { %1646 = vmatprep.mubr.msk.f32.mxu1 %vm209_vm1, %v2063_v19  ;;  %v171_v39 = vld [vmem:[%s1997_s7 + $0x8] sm:$0xff] }
  0x27   : > { %1623 = vmatmul.mubr.msk.f32.gmra.mxu0 %vm209_vm1, %v179_v20 }
  0x28   : > { %1647 = vmatmul.mubr.msk.f32.gmra.mxu1 %vm209_vm1, %v2073_v21  ;;  %1625 = vmatprep.mubr.msk.f32.mxu0 %vm209_vm1, %v180_v22 }
  0x29   : > { %1649 = vmatprep.mubr.msk.f32.mxu1 %vm209_vm1, %v2077_v23 }
  0x2b   : > { %1626 = vmatmul.mubr.msk.f32.gmra.mxu0 %vm209_vm1, %v181_v24 }
  0x2c   : > { %1650 = vmatmul.mubr.msk.f32.gmra.mxu1 %vm209_vm1, %v2087_v25  ;;  %1628 = vmatprep.mubr.msk.f32.mxu0 %vm209_vm1, %v182_v26 }
  0x2d   : > { %1652 = vmatprep.mubr.msk.f32.mxu1 %vm209_vm1, %v2091_v27 }
  0x2f   : > { %1629 = vmatmul.mubr.msk.f32.gmra.mxu0 %vm209_vm1, %v183_v28 }
  0x30   : > { %1653 = vmatmul.mubr.msk.f32.gmra.mxu1 %vm209_vm1, %v2101_v29  ;;  %1631 = vmatprep.mubr.msk.f32.mxu0 %vm209_vm1, %v184_v30 }
  0x31   : > { %1655 = vmatprep.mubr.msk.f32.mxu1 %vm209_vm1, %v2105_v31 }
  0x33   : > { %1632 = vmatmul.mubr.msk.f32.gmra.mxu0 %vm209_vm1, %v185_v32 }
  0x34   : > { %1656 = vmatmul.mubr.msk.f32.gmra.mxu1 %vm209_vm1, %v2115_v33  ;;  %1634 = vmatprep.mubr.msk.f32.mxu0 %vm209_vm1, %v186_v34 }
  0x35   : > { %1658 = vmatprep.mubr.msk.f32.mxu1 %vm209_vm1, %v2119_v35 }
  0x37   : > { %1635 = vmatmul.mubr.msk.f32.gmra.mxu0 %vm209_vm1, %v187_v36 }
  0x38   : > { %1659 = vmatmul.mubr.msk.f32.gmra.mxu1 %vm209_vm1, %v2129_v37  ;;  %1717 = vmatprep.mubr.msk.f32.mxu0 %vm209_vm1, %v2016_v8 }
  0x39   : > { %1665 = vmatprep.mubr.msk.f32.mxu1 %vm209_vm1, %v170_v38 }
  0x3b   : > { %1718 = vmatmul.mubr.msk.f32.vlgmr.msra.gmra.mxu0 %vm209_vm1, %v2034_v12 }
  0x3c   : > { %1666 = vmatmul.mubr.msk.f32.vlgmr.msra.gmra.mxu1 %vm209_vm1, %v171_v39  ;;  %1720 = vmatprep.mubr.msk.f32.mxu0 %vm209_vm1, %v2044_v14 }
  0x3d   : > { %1668 = vmatprep.mubr.msk.f32.mxu1 %vm209_vm1, %v2000_v4 }
  0x3f   : > { %1721 = vmatmul.mubr.msk.f32.gmra.mxu0 %vm209_vm1, %v177_v16 }
  0x40   : > { %1669 = vmatmul.mubr.msk.f32.gmra.mxu1 %vm209_vm1, %v2006_v6  ;;  %1723 = vmatprep.mubr.msk.f32.mxu0 %vm209_vm1, %v178_v18 }
  0x41   : > { %1671 = vmatprep.mubr.msk.f32.mxu1 %vm209_vm1, %v2016_v8 }
  0x43   : > { %1724 = vmatmul.mubr.msk.f32.gmra.mxu0 %vm209_vm1, %v179_v20 }
  0x44   : > { %1672 = vmatmul.mubr.msk.f32.gmra.mxu1 %vm209_vm1, %v2034_v12  ;;  %1726 = vmatprep.mubr.msk.f32.mxu0 %vm209_vm1, %v180_v22 }
  0x45   : > { %1674 = vmatprep.mubr.msk.f32.mxu1 %vm209_vm1, %v2044_v14 }
  0x47   : > { %1727 = vmatmul.mubr.msk.f32.gmra.mxu0 %vm209_vm1, %v181_v24 }
  0x48   : > { %1675 = vmatmul.mubr.msk.f32.gmra.mxu1 %vm209_vm1, %v177_v16  ;;  %1729 = vmatprep.mubr.msk.f32.mxu0 %vm209_vm1, %v182_v26 }
  0x49   : > { %1677 = vmatprep.mubr.msk.f32.mxu1 %vm209_vm1, %v178_v18 }
  0x4b   : > { %1730 = vmatmul.mubr.msk.f32.gmra.mxu0 %vm209_vm1, %v183_v28 }
  0x4c   : > { %1678 = vmatmul.mubr.msk.f32.gmra.mxu1 %vm209_vm1, %v179_v20  ;;  %1732 = vmatprep.mubr.msk.f32.mxu0 %vm209_vm1, %v184_v30 }
  0x4d   : > { %1680 = vmatprep.mubr.msk.f32.mxu1 %vm209_vm1, %v180_v22 }
  0x4f   : > { %1733 = vmatmul.mubr.msk.f32.gmra.mxu0 %vm209_vm1, %v185_v32 }
  0x50   : > { %1681 = vmatmul.mubr.msk.f32.gmra.mxu1 %vm209_vm1, %v181_v24  ;;  %1735 = vmatprep.mubr.msk.f32.mxu0 %vm209_vm1, %v186_v34 }
  0x51   : > { %1683 = vmatprep.mubr.msk.f32.mxu1 %vm209_vm1, %v182_v26 }
  0x53   : > { %1736 = vmatmul.mubr.msk.f32.gmra.mxu0 %vm209_vm1, %v187_v36 }
  0x54   : > { %1684 = vmatmul.mubr.msk.f32.gmra.mxu1 %vm209_vm1, %v183_v28  ;;  %1738 = vmatprep.mubr.msk.f32.mxu0 %vm209_vm1, %v2003_v5 }
  0x55   : > { %1686 = vmatprep.mubr.msk.f32.mxu1 %vm209_vm1, %v184_v30 }
  0x57   : > { %1739 = vmatmul.mubr.msk.f32.gmra.mxu0 %vm209_vm1, %v2013_v7 }
  0x58   : > { %1687 = vmatmul.mubr.msk.f32.gmra.mxu1 %vm209_vm1, %v185_v32  ;;  %1741 = vmatprep.mubr.msk.f32.mxu0 %vm209_vm1, %v2019_v9 }
  0x59   : > { %1689 = vmatprep.mubr.msk.f32.mxu1 %vm209_vm1, %v186_v34 }
  0x5b   : > { %1742 = vmatmul.mubr.msk.f32.gmra.mxu0 %vm209_vm1, %v2037_v13 }
  0x5c   : > { %1690 = vmatmul.mubr.msk.f32.gmra.mxu1 %vm209_vm1, %v187_v36  ;;  %1744 = vmatprep.mubr.msk.f32.mxu0 %vm209_vm1, %v2047_v15 }
  0x5d   : > { %1692 = vmatprep.mubr.msk.f32.mxu1 %vm209_vm1, %v2003_v5 }
  0x5f   : > { %1745 = vmatmul.mubr.msk.f32.gmra.mxu0 %vm209_vm1, %v2059_v17 }
  0x60   : > { %1693 = vmatmul.mubr.msk.f32.gmra.mxu1 %vm209_vm1, %v2013_v7  ;;  %1747 = vmatprep.mubr.msk.f32.mxu0 %vm209_vm1, %v2063_v19 }
  0x61   : > { %1695 = vmatprep.mubr.msk.f32.mxu1 %vm209_vm1, %v2019_v9 }
  0x63   : > { %1748 = vmatmul.mubr.msk.f32.gmra.mxu0 %vm209_vm1, %v2073_v21 }
  0x64   : > { %1696 = vmatmul.mubr.msk.f32.gmra.mxu1 %vm209_vm1, %v2037_v13  ;;  %1750 = vmatprep.mubr.msk.f32.mxu0 %vm209_vm1, %v2077_v23 }
  0x65   : > { %1698 = vmatprep.mubr.msk.f32.mxu1 %vm209_vm1, %v2047_v15 }
  0x67   : > { %1751 = vmatmul.mubr.msk.f32.gmra.mxu0 %vm209_vm1, %v2087_v25 }
  0x68   : > { %1699 = vmatmul.mubr.msk.f32.gmra.mxu1 %vm209_vm1, %v2059_v17  ;;  %1753 = vmatprep.mubr.msk.f32.mxu0 %vm209_vm1, %v2091_v27 }
  0x69   : > { %1701 = vmatprep.mubr.msk.f32.mxu1 %vm209_vm1, %v2063_v19 }
  0x6b   : > { %1754 = vmatmul.mubr.msk.f32.gmra.mxu0 %vm209_vm1, %v2101_v29 }
  0x6c   : > { %1702 = vmatmul.mubr.msk.f32.gmra.mxu1 %vm209_vm1, %v2073_v21  ;;  %1756 = vmatprep.mubr.msk.f32.mxu0 %vm209_vm1, %v2105_v31 }
  0x6d   : > { %1704 = vmatprep.mubr.msk.f32.mxu1 %vm209_vm1, %v2077_v23 }
  0x6f   : > { %1757 = vmatmul.mubr.msk.f32.gmra.mxu0 %vm209_vm1, %v2115_v33 }
  0x70   : > { %1705 = vmatmul.mubr.msk.f32.gmra.mxu1 %vm209_vm1, %v2087_v25  ;;  %1759 = vmatprep.mubr.msk.f32.mxu0 %vm209_vm1, %v2119_v35 }
  0x71   : > { %1707 = vmatprep.mubr.msk.f32.mxu1 %vm209_vm1, %v2091_v27 }
  0x73   : > { %1760 = vmatmul.mubr.msk.f32.gmra.mxu0 %vm209_vm1, %v2129_v37 }
  0x74   : > { %1708 = vmatmul.mubr.msk.f32.gmra.mxu1 %vm209_vm1, %v2101_v29  ;;  %1762 = vmatprep.mubr.msk.f32.mxu0 %vm209_vm1, %v799_v40 }
  0x75   : > { %1710 = vmatprep.mubr.msk.f32.mxu1 %vm209_vm1, %v2105_v31 }
  0x77   : > { %1763 = vmatmul.mubr.msk.f32.gmra.mxu0 %vm209_vm1, %v800_v41 }
  0x78   : > { %1711 = vmatmul.mubr.msk.f32.gmra.mxu1 %vm209_vm1, %v2115_v33 }
  0xdb   : > { %v1615_v42 = vpop.f32.mrf.mxu0 }
  0xdc   : > { %v2240_v43 = vpop.f32.mrf.mxu1 }
  0xdd   : > { %v376_v44 = vpop.f32.mrf.mxu0 }
  0xde   : > { %v2242_v45 = vpop.f32.mrf.mxu1 }
  0xdf   : > { %v1618_v46 = vpop.f32.mrf.mxu0 }
  0xe0   : > { %v2244_v47 = vpop.f32.mrf.mxu1 }
  0xe1   : > { %v386_v48 = vpop.f32.mrf.mxu0 }
  0xe2   : > { %v2246_v49 = vpop.f32.mrf.mxu1 }
  0xe3   : > { %v1621_v50 = vpop.f32.mrf.mxu0 }
  0xe4   : > { %v2248_v51 = vpop.f32.mrf.mxu1 }
  0xe5   : > { %v396_v52 = vpop.f32.mrf.mxu0 }
  0xe6   : > { %v2250_v53 = vpop.f32.mrf.mxu1 }
  0xe7   : > { %v1624_v54 = vpop.f32.mrf.mxu0 }
  0xe8   : > { %v2252_v55 = vpop.f32.mrf.mxu1 }
  0xe9   : > { %v406_v56 = vpop.f32.mrf.mxu0 }
  0xea   : > { %v2254_v57 = vpop.f32.mrf.mxu1 }
  0xeb   : > { %v1627_v58 = vpop.f32.mrf.mxu0 }
  0xec   : > { %v2256_v59 = vpop.f32.mrf.mxu1 }
  0xed   : > { %v416_v60 = vpop.f32.mrf.mxu0 }
  0xee   : > { %v2258_v61 = vpop.f32.mrf.mxu1 }
  0xef   : > { %v2260_v62 = vpop.f32.mrf.mxu0 }
  0xf0   : > { %v2262_v63 = vpop.f32.mrf.mxu1 }
  0xf1   : > { %v2264_v0 = vpop.f32.mrf.mxu0 }
  0xf2   : > { %v2266_v1 = vpop.f32.mrf.mxu1 }
  0xf3   : > { %v2268_v2 = vpop.f32.mrf.mxu0 }
  0xf4   : > { %v2270_v3 = vpop.f32.mrf.mxu1 }
  0xf5   : > { %v2272_v4 = vpop.f32.mrf.mxu0 }
  0xf6   : > { %v2274_v5 = vpop.f32.mrf.mxu1 }
  0xf7   : > { %v2276_v6 = vpop.f32.mrf.mxu0 }
  0xf8   : > { %v2278_v7 = vpop.f32.mrf.mxu1 }
  0xf9   : > { %v2280_v8 = vpop.f32.mrf.mxu0 }
  0xfa   : > { %v2282_v9 = vpop.f32.mrf.mxu1 }
  0xfb   : > { %v1719_v11 = vpop.f32.mrf.mxu0 }
  0xfc   : > { %v1667_v10 = vpop.f32.mrf.mxu1 }
  0xfd   : > { %v969_v13 = vpop.f32.mrf.mxu0  ;;  %v616_v14 = vadd.f32 %v1667_v10, %v1615_v42 }
  0xfe   : > { %v610_v12 = vpop.f32.mrf.mxu1 }
  0xff   : > { %v611_v15 = vadd.f32 %v610_v12, %v376_v44  ;;  %v1722_v17 = vpop.f32.mrf.mxu0  ;;  %v2286_v21 = vadd.f32 %v1719_v11, %v616_v14 }
 0x100   : > { %v1670_v16 = vpop.f32.mrf.mxu1 }
 0x101   : > { %v2284_v18 = vadd.f32 %v969_v13, %v611_v15  ;;  %v979_v20 = vpop.f32.mrf.mxu0  ;;  %v626_v22 = vadd.f32 %v1670_v16, %v1618_v46 }
 0x102   : > { %v620_v19 = vpop.f32.mrf.mxu1 }
 0x103   : > { %v621_v23 = vadd.f32 %v620_v19, %v386_v48  ;;  %v1725_v25 = vpop.f32.mrf.mxu0  ;;  %v1160_v26 = vadd.f32 %v2286_v21, %v2284_v18  ;;  %v2292_v30 = vadd.f32 %v1722_v17, %v626_v22 }
 0x104   : > { %v1673_v24 = vpop.f32.mrf.mxu1 }
 0x105   : > { %v2290_v27 = vadd.f32 %v979_v20, %v621_v23  ;;  %v989_v29 = vpop.f32.mrf.mxu0  ;;  %v636_v32 = vadd.f32 %v1673_v24, %v1621_v50 }
 0x106   : > { %v630_v28 = vpop.f32.mrf.mxu1 }
 0x107   : > { %v1161_v31 = vadd.f32 %v1160_v26, %v2290_v27  ;;  %v631_v33 = vadd.f32 %v630_v28, %v396_v52  ;;  %v1728_v35 = vpop.f32.mrf.mxu0  ;;  %v2298_v40 = vadd.f32 %v1725_v25, %v636_v32 }
 0x108   : > { %v1676_v34 = vpop.f32.mrf.mxu1 }
 0x109   : > { %v2295_v36 = vadd.f32 %v989_v29, %v631_v33  ;;  %v1162_v37 = vadd.f32 %v1161_v31, %v2292_v30  ;;  %v999_v39 = vpop.f32.mrf.mxu0  ;;  %v646_v42 = vadd.f32 %v1676_v34, %v1624_v54 }
 0x10a   : > { %v640_v38 = vpop.f32.mrf.mxu1 }
 0x10b   : > { %v1163_v41 = vadd.f32 %v1162_v37, %v2295_v36  ;;  %v641_v44 = vadd.f32 %v640_v38, %v406_v56  ;;  %v1731_v48 = vpop.f32.mrf.mxu0  ;;  %v2304_v12 = vadd.f32 %v1728_v35, %v646_v42 }
 0x10c   : > { %v1679_v46 = vpop.f32.mrf.mxu1 }
 0x10d   : > { %v2301_v10 = vadd.f32 %v999_v39, %v641_v44  ;;  %v1164_v50 = vadd.f32 %v1163_v41, %v2298_v40  ;;  %v1009_v11 = vpop.f32.mrf.mxu0  ;;  %v656_v14 = vadd.f32 %v1679_v46, %v1627_v58 }
 0x10e   : > { %v650_v52 = vpop.f32.mrf.mxu1 }
 0x10f   : > { %v1165_v13 = vadd.f32 %v1164_v50, %v2301_v10  ;;  %v651_v15 = vadd.f32 %v650_v52, %v416_v60  ;;  %v1734_v17 = vpop.f32.mrf.mxu0  ;;  %v2310_v22 = vadd.f32 %v1731_v48, %v656_v14 }
 0x110   : > { %v1682_v16 = vpop.f32.mrf.mxu1 }
 0x111   : > { %v2307_v19 = vadd.f32 %v1009_v11, %v651_v15  ;;  %v1166_v54 = vadd.f32 %v1165_v13, %v2304_v12  ;;  %v1019_v20 = vpop.f32.mrf.mxu0  ;;  %v666_v24 = vadd.f32 %v1682_v16, %v2260_v62 }
 0x112   : > { %v660_v56 = vpop.f32.mrf.mxu1 }
 0x113   : > { %v1167_v23 = vadd.f32 %v1166_v54, %v2307_v19  ;;  %v661_v25 = vadd.f32 %v660_v56, %v2264_v0  ;;  %v1737_v28 = vpop.f32.mrf.mxu0  ;;  %v2318_v32 = vadd.f32 %v1734_v17, %v666_v24 }
 0x114   : > { %v1685_v26 = vpop.f32.mrf.mxu1 }
 0x115   : > { %v2315_v58 = vadd.f32 %v1019_v20, %v661_v25  ;;  %v1168_v60 = vadd.f32 %v1167_v23, %v2310_v22  ;;  %v1029_v31 = vpop.f32.mrf.mxu0  ;;  %v676_v34 = vadd.f32 %v1685_v26, %v2268_v2 }
 0x116   : > { %v670_v29 = vpop.f32.mrf.mxu1 }
 0x117   : > { %v1169_v33 = vadd.f32 %v1168_v60, %v2315_v58  ;;  %v671_v35 = vadd.f32 %v670_v29, %v2272_v4  ;;  %v1740_v62 = vpop.f32.mrf.mxu0  ;;  %v2326_v42 = vadd.f32 %v1737_v28, %v676_v34 }
 0x118   : > { %v1688_v37 = vpop.f32.mrf.mxu1 }
 0x119   : > { %v2323_v38 = vadd.f32 %v1029_v31, %v671_v35  ;;  %v1170_v0 = vadd.f32 %v1169_v33, %v2318_v32  ;;  %v1039_v41 = vpop.f32.mrf.mxu0  ;;  %v686_v46 = vadd.f32 %v1688_v37, %v2276_v6 }
 0x11a   : > { %v680_v39 = vpop.f32.mrf.mxu1 }
 0x11b   : > { %v1171_v44 = vadd.f32 %v1170_v0, %v2323_v38  ;;  %v681_v48 = vadd.f32 %v680_v39, %v2280_v8  ;;  %v1743_v2 = vpop.f32.mrf.mxu0  ;;  %v2334_v14 = vadd.f32 %v1740_v62, %v686_v46 }
 0x11c   : > { %v1691_v50 = vpop.f32.mrf.mxu1 }
 0x11d   : > { %v2331_v52 = vadd.f32 %v1039_v41, %v681_v48  ;;  %v1172_v4 = vadd.f32 %v1171_v44, %v2326_v42  ;;  %v1049_v13 = vpop.f32.mrf.mxu0  ;;  %v696_v16 = vadd.f32 %v1691_v50, %v2240_v43 }
 0x11e   : > { %v690_v11 = vpop.f32.mrf.mxu1 }
 0x11f   : > { %v1173_v15 = vadd.f32 %v1172_v4, %v2331_v52  ;;  %v691_v17 = vadd.f32 %v690_v11, %v2242_v45  ;;  %v1746_v6 = vpop.f32.mrf.mxu0  ;;  %v2342_v24 = vadd.f32 %v1743_v2, %v696_v16 }
 0x120   : > { %v1694_v54 = vpop.f32.mrf.mxu1 }
 0x121   : > { %v2339_v56 = vadd.f32 %v1049_v13, %v691_v17  ;;  %v1174_v8 = vadd.f32 %v1173_v15, %v2334_v14  ;;  %v1059_v23 = vpop.f32.mrf.mxu0  ;;  %v706_v26 = vadd.f32 %v1694_v54, %v2244_v47 }
 0x122   : > { %v700_v20 = vpop.f32.mrf.mxu1 }
 0x123   : > { %v1175_v25 = vadd.f32 %v1174_v8, %v2339_v56  ;;  %v701_v28 = vadd.f32 %v700_v20, %v2246_v49  ;;  %v1749_v43 = vpop.f32.mrf.mxu0  ;;  %v2350_v34 = vadd.f32 %v1746_v6, %v706_v26 }
 0x124   : > { %v1697_v60 = vpop.f32.mrf.mxu1 }
 0x125   : > { %v2347_v29 = vadd.f32 %v1059_v23, %v701_v28  ;;  %v1176_v45 = vadd.f32 %v1175_v25, %v2342_v24  ;;  %v1069_v33 = vpop.f32.mrf.mxu0  ;;  %v716_v37 = vadd.f32 %v1697_v60, %v2248_v51 }
 0x126   : > { %v710_v31 = vpop.f32.mrf.mxu1 }
 0x127   : > { %v1177_v35 = vadd.f32 %v1176_v45, %v2347_v29  ;;  %v711_v62 = vadd.f32 %v710_v31, %v2250_v53  ;;  %v1752_v47 = vpop.f32.mrf.mxu0  ;;  %v2358_v46 = vadd.f32 %v1749_v43, %v716_v37 }
 0x128   : > { %v1700_v0 = vpop.f32.mrf.mxu1 }
 0x129   : > { %v2355_v39 = vadd.f32 %v1069_v33, %v711_v62  ;;  %v1178_v49 = vadd.f32 %v1177_v35, %v2350_v34  ;;  %v1079_v44 = vpop.f32.mrf.mxu0  ;;  %v726_v50 = vadd.f32 %v1700_v0, %v2252_v55 }
 0x12a   : > { %v720_v41 = vpop.f32.mrf.mxu1 }
 0x12b   : > { %v1179_v48 = vadd.f32 %v1178_v49, %v2355_v39  ;;  %v721_v2 = vadd.f32 %v720_v41, %v2254_v57  ;;  %v1755_v51 = vpop.f32.mrf.mxu0  ;;  %v2366_v16 = vadd.f32 %v1752_v47, %v726_v50 }
 0x12c   : > { %v1703_v4 = vpop.f32.mrf.mxu1 }
 0x12d   : > { %v2363_v11 = vadd.f32 %v1079_v44, %v721_v2  ;;  %v1180_v53 = vadd.f32 %v1179_v48, %v2358_v46  ;;  %v1089_v15 = vpop.f32.mrf.mxu0  ;;  %v736_v54 = vadd.f32 %v1703_v4, %v2256_v59 }
 0x12e   : > { %v730_v13 = vpop.f32.mrf.mxu1 }
 0x12f   : > { %v1181_v17 = vadd.f32 %v1180_v53, %v2363_v11  ;;  %v731_v6 = vadd.f32 %v730_v13, %v2258_v61  ;;  %v1758_v55 = vpop.f32.mrf.mxu0  ;;  %v1153_v26 = vadd.f32 %v1755_v51, %v736_v54 }
 0x130   : > { %v1706_v8 = vpop.f32.mrf.mxu1 }
 0x131   : > { %v1152_v20 = vadd.f32 %v1089_v15, %v731_v6  ;;  %v1182_v57 = vadd.f32 %v1181_v17, %v2366_v16  ;;  %v1099_v25 = vpop.f32.mrf.mxu0  ;;  %v746_v60 = vadd.f32 %v1706_v8, %v2262_v63 }
 0x132   : > { %v740_v23 = vpop.f32.mrf.mxu1 }
 0x133   : > { %v1183_v28 = vadd.f32 %v1182_v57, %v1152_v20  ;;  %v741_v43 = vadd.f32 %v740_v23, %v2266_v1  ;;  %v1761_v31 = vpop.f32.mrf.mxu0  ;;  %v1155_v61 = vadd.f32 %v1758_v55, %v746_v60 }
 0x134   : > { %v1709_v45 = vpop.f32.mrf.mxu1 }
 0x135   : > { %v1154_v33 = vadd.f32 %v1099_v25, %v741_v43  ;;  %v1184_v35 = vadd.f32 %v1183_v28, %v1153_v26  ;;  %v1109_v37 = vpop.f32.mrf.mxu0  ;;  %v756_v0 = vadd.f32 %v1709_v45, %v2270_v3 }
 0x136   : > { %v750_v59 = vpop.f32.mrf.mxu1 }
 0x137   : > { %v1185_v62 = vadd.f32 %v1184_v35, %v1154_v33  ;;  %v751_v47 = vadd.f32 %v750_v59, %v2274_v5  ;;  %v1764_v41 = vpop.f32.mrf.mxu0  ;;  %v1157_v1 = vadd.f32 %v1761_v31, %v756_v0 }
 0x138   : > { %v1712_v49 = vpop.f32.mrf.mxu1 }
 0x139   : > { %v1156_v44 = vadd.f32 %v1109_v37, %v751_v47  ;;  %v1186_v48 = vadd.f32 %v1185_v62, %v1155_v61  ;;  %v766_v2 = vadd.f32 %v1712_v49, %v2278_v7  ;;  %v1119_v51 = vpop.f32.mrf.mxu0 }
 0x13a   : > { %v760_v63 = vpop.f32.mrf.mxu1 }
 0x13b   : > { %v1187_v50 = vadd.f32 %v1186_v48, %v1156_v44  ;;  %v761_v4 = vadd.f32 %v760_v63, %v2282_v9  ;;  %v1159_v15 = vadd.f32 %v1764_v41, %v766_v2 }
 0x13d   : > { %v1158_v53 = vadd.f32 %v1119_v51, %v761_v4  ;;  %v1188_v13 = vadd.f32 %v1187_v50, %v1157_v1 }
 0x13f   : > { %v1189_v3 = vadd.f32 %v1188_v13, %v1158_v53 }
 0x141   : > { %v1190_v17 = vadd.f32 %v1189_v3, %v1159_v15 }
 0x143   : > { %v1191_v5 = vrot.slane %v1190_v17, 4 }
 0x145   : > { %v1192_v54 = vadd.f32 %v1191_v5, %v1190_v17 }
 0x147   : > { %v1193_v6 = vrot.slane %v1192_v54, 2 }
 0x149   : > { %v1194_v8 = vadd.f32 %v1193_v6, %v1192_v54 }
 0x14b   : > { %v1195_v55 = vrot.slane %v1194_v8, 1 }
 0x14d   : > { %v1196_v57 = vadd.f32 %v1195_v55, %v1194_v8 }
 0x14f   : > { %v1197_v23 = vmul.f32 0.00390625, %v1196_v57  ;;  %1299 = vst [vmem:[%s2381_s24] sm:$0x1] %v1196_v57 }
 0x151   : > { %v1206_v7 = vsub.f32 %v2307_v19, %v1197_v23  ;;  %v1207_v9 = vsub.f32 %v2310_v22, %v1197_v23  ;;  %v1208_v25 = vsub.f32 %v2315_v58, %v1197_v23  ;;  %v1209_v28 = vsub.f32 %v2318_v32, %v1197_v23 }
 0x152   : > { %v1210_v60 = vsub.f32 %v2323_v38, %v1197_v23  ;;  %v1211_v43 = vsub.f32 %v2326_v42, %v1197_v23  ;;  %v1212_v45 = vsub.f32 %v2331_v52, %v1197_v23  ;;  %v1213_v31 = vsub.f32 %v2334_v14, %v1197_v23 }
 0x153   : > { %v1214_v35 = vsub.f32 %v2339_v56, %v1197_v23  ;;  %v1215_v59 = vsub.f32 %v2342_v24, %v1197_v23  ;;  %v1216_v19 = vsub.f32 %v2347_v29, %v1197_v23  ;;  %v1217_v22 = vsub.f32 %v2350_v34, %v1197_v23 }
 0x154   : > { %v1218_v58 = vsub.f32 %v2355_v39, %v1197_v23  ;;  %v1219_v32 = vsub.f32 %v2358_v46, %v1197_v23  ;;  %v1220_v38 = vsub.f32 %v2363_v11, %v1197_v23  ;;  %v1221_v42 = vsub.f32 %v2366_v16, %v1197_v23 }
 0x155   : > { %v1222_v37 = vsub.f32 %v1152_v20, %v1197_v23  ;;  %v2400_v52 = vsub.f32 %v1153_v26, %v1197_v23  ;;  %v2402_v14 = vsub.f32 %v1154_v33, %v1197_v23  ;;  %v2404_v56 = vsub.f32 %v1155_v61, %v1197_v23 }
 0x156   : > { %v2406_v24 = vsub.f32 %v1156_v44, %v1197_v23  ;;  %v2408_v29 = vsub.f32 %v1157_v1, %v1197_v23  ;;  %v2410_v34 = vsub.f32 %v1158_v53, %v1197_v23  ;;  %v2412_v39 = vsub.f32 %v1159_v15, %v1197_v23 }
 0x157   : > { %v1198_v46 = vsub.f32 %v2284_v18, %v1197_v23  ;;  %v1199_v11 = vsub.f32 %v2286_v21, %v1197_v23  ;;  %v1200_v16 = vsub.f32 %v2290_v27, %v1197_v23  ;;  %v1201_v33 = vsub.f32 %v2292_v30, %v1197_v23 }
 0x158   : > { %v1202_v61 = vsub.f32 %v2295_v36, %v1197_v23  ;;  %v1203_v47 = vsub.f32 %v2298_v40, %v1197_v23  ;;  %v1204_v44 = vsub.f32 %v2301_v10, %v1197_v23  ;;  %v1205_v21 = vsub.f32 %v2304_v12, %v1197_v23 }
 0x159   : > { %v1230_v20 = vmul.f32 %v1198_v46, %v1198_v46  ;;  %v1231_v26 = vmul.f32 %v1199_v11, %v1199_v11  ;;  %v1232_v62 = vmul.f32 %v1200_v16, %v1200_v16  ;;  %v1233_v49 = vmul.f32 %v1201_v33, %v1201_v33 }
 0x15a   : > { %v1234_v48 = vmul.f32 %v1202_v61, %v1202_v61  ;;  %v1235_v63 = vmul.f32 %v1203_v47, %v1203_v47  ;;  %v1236_v1 = vmul.f32 %v1204_v44, %v1204_v44  ;;  %v1237_v2 = vmul.f32 %v1205_v21, %v1205_v21 }
 0x15b   : > { %v1262_v0 = vadd.f32 %v1231_v26, %v1230_v20  ;;  %v1238_v4 = vmul.f32 %v1206_v7, %v1206_v7  ;;  %v1239_v51 = vmul.f32 %v1207_v9, %v1207_v9  ;;  %v1240_v13 = vmul.f32 %v1208_v25, %v1208_v25 }
 0x15c   : > { %v1241_v15 = vmul.f32 %v1209_v28, %v1209_v28  ;;  %v1242_v17 = vmul.f32 %v1210_v60, %v1210_v60  ;;  %v1243_v5 = vmul.f32 %v1211_v43, %v1211_v43  ;;  %v1244_v6 = vmul.f32 %v1212_v45, %v1212_v45 }
 0x15d   : > { %v1263_v41 = vadd.f32 %v1262_v0, %v1232_v62  ;;  %v1245_v8 = vmul.f32 %v1213_v31, %v1213_v31  ;;  %v1246_v57 = vmul.f32 %v1214_v35, %v1214_v35  ;;  %v1247_v46 = vmul.f32 %v1215_v59, %v1215_v59 }
 0x15e   : > { %v1248_v7 = vmul.f32 %v1216_v19, %v1216_v19  ;;  %v1249_v9 = vmul.f32 %v1217_v22, %v1217_v22  ;;  %v1250_v25 = vmul.f32 %v1218_v58, %v1218_v58  ;;  %v1251_v28 = vmul.f32 %v1219_v32, %v1219_v32 }
 0x15f   : > { %v1264_v18 = vadd.f32 %v1263_v41, %v1233_v49  ;;  %v1252_v60 = vmul.f32 %v1220_v38, %v1220_v38  ;;  %v1253_v43 = vmul.f32 %v1221_v42, %v1221_v42  ;;  %v1254_v45 = vmul.f32 %v1222_v37, %v1222_v37 }
 0x160   : > { %v1255_v31 = vmul.f32 %v2400_v52, %v2400_v52  ;;  %v1256_v59 = vmul.f32 %v2402_v14, %v2402_v14  ;;  %v1257_v22 = vmul.f32 %v2404_v56, %v2404_v56  ;;  %v1258_v32 = vmul.f32 %v2406_v24, %v2406_v24 }
 0x161   : > { %v1265_v27 = vadd.f32 %v1264_v18, %v1234_v48  ;;  %v1259_v42 = vmul.f32 %v2408_v29, %v2408_v29  ;;  %v1260_v52 = vmul.f32 %v2410_v34, %v2410_v34  ;;  %v1261_v47 = vmul.f32 %v2412_v39, %v2412_v39 }
 0x163   : > { %v1266_v50 = vadd.f32 %v1265_v27, %v1235_v63 }
 0x165   : > { %v1267_v30 = vadd.f32 %v1266_v50, %v1236_v1 }
 0x167   : > { %v1268_v36 = vadd.f32 %v1267_v30, %v1237_v2 }
 0x169   : > { %v1269_v53 = vadd.f32 %v1268_v36, %v1238_v4 }
 0x16b   : > { %v1270_v40 = vadd.f32 %v1269_v53, %v1239_v51 }
 0x16d   : > { %v1271_v3 = vadd.f32 %v1270_v40, %v1240_v13 }
 0x16f   : > { %v1272_v10 = vadd.f32 %v1271_v3, %v1241_v15 }
 0x171   : > { %v1273_v54 = vadd.f32 %v1272_v10, %v1242_v17 }
 0x173   : > { %v1274_v12 = vadd.f32 %v1273_v54, %v1243_v5 }
 0x175   : > { %v1275_v55 = vadd.f32 %v1274_v12, %v1244_v6 }
 0x177   : > { %v1276_v23 = vadd.f32 %v1275_v55, %v1245_v8 }
 0x179   : > { %v1277_v11 = vadd.f32 %v1276_v23, %v1246_v57 }
 0x17b   : > { %v1278_v16 = vadd.f32 %v1277_v11, %v1247_v46 }
 0x17d   : > { %v1279_v20 = vadd.f32 %v1278_v16, %v1248_v7 }
 0x17f   : > { %v1280_v26 = vadd.f32 %v1279_v20, %v1249_v9 }
 0x181   : > { %v1281_v33 = vadd.f32 %v1280_v26, %v1250_v25 }
 0x183   : > { %v1282_v61 = vadd.f32 %v1281_v33, %v1251_v28 }
 0x185   : > { %v1283_v62 = vadd.f32 %v1282_v61, %v1252_v60 }
 0x187   : > { %v1284_v0 = vadd.f32 %v1283_v62, %v1253_v43 }
 0x189   : > { %v1285_v35 = vadd.f32 %v1284_v0, %v1254_v45 }
 0x18b   : > { %v1286_v19 = vadd.f32 %v1285_v35, %v1255_v31 }
 0x18d   : > { %v1287_v58 = vadd.f32 %v1286_v19, %v1256_v59 }
 0x18f   : > { %v1288_v38 = vadd.f32 %v1287_v58, %v1257_v22 }
 0x191   : > { %v1289_v37 = vadd.f32 %v1288_v38, %v1258_v32 }
 0x193   : > { %v1290_v14 = vadd.f32 %v1289_v37, %v1259_v42 }
 0x195   : > { %v1291_v56 = vadd.f32 %v1290_v14, %v1260_v52 }
 0x197   : > { %v1292_v49 = vadd.f32 %v1291_v56, %v1261_v47 }
 0x199   : > { %v1293_v41 = vrot.slane %v1292_v49, 4 }
 0x19b   : > { %v1294_v44 = vadd.f32 %v1293_v41, %v1292_v49 }
 0x19d   : > { %v1295_v24 = vrot.slane %v1294_v44, 2 }
 0x19f   : > { %v1296_v48 = vadd.f32 %v1295_v24, %v1294_v44 }
 0x1a1   : > { %v1297_v29 = vrot.slane %v1296_v48, 1 }
 0x1a3   : > { %v1298_v18 = vadd.f32 %v1297_v29, %v1296_v48 }
 0x1a5   : > { %1300 = vst [vmem:[%s2381_s24 + $0x1] sm:$0x1] %v1298_v18 }
 0x1a6   : > { %1838 = shalt.err (!%p1835_p5)
}
 0x1a7   : > { %s1839_s6 = scalar_lea.hbm %s1314_s29, 32  ;;  %s1843_s15 = scalar_lea.hbm %s2480_s2, 64 }
 0x1a8   : > { %p1840_p6 = scmp.ne.s32.totalorder %s1314_s29, %s1839_s6  ;;  %p1844_p10 = scmp.lt.s32.totalorder %s1314_s29, %s2480_s2 }
 0x1a9   : > { %p1845_p11 = scmp.lt.s32.totalorder %s1843_s15, %s1839_s6 }
 0x1aa   : > { %p1841_p7 = pnand %p1840_p6, %p1959_p4 }
 0x1ab   : > { %p1846_p12 = por %p1845_p11, %p1844_p10 }
 0x1ac   : > { %p1842_p9 = pneg %p1841_p7 }
 0x1ae   : > { %p1847_p13 = pnand %p1846_p12, %p1842_p9 }
 0x1b0   : > { %1850 = shalt.err (!%p1847_p13)
}
 0x1b1   : > { %1770 = dma.vmem_to_hbm [thread:$0]  (%p1959_p4), %s1317_s26, 32, %s1314_s29, %s1302_s30  }
 0x1b2 PF: > { %p1776_p0 = scmp.ge.s32.totalorder %s1901_s14, 2  ;;  %s1328_s20 = sand.u32 1, %s1881_s9  }
 0x1b3   : > { %s1329_s23 = scalar_lea.sflag [#allocation3], %s1328_s20 }
 0x1b4   : > { %p1773_p1 = pnand %p1776_p0, %p1966_p8 }
 0x1b6   : > { %p1774_p2 = pneg %p1773_p1 }
 0x1b8   : > { %1876 = dma.done.wait (%p1774_p2), %s1329_s23, 32  }
 0x1b9   : > { %1878 = vsyncadd (%p1774_p2), %s1329_s23, 4294967264  ;;  %s15_s14 = sadd.s32 1, %s1901_s14   ;;  %s2483_s9 = smov %s1885_s10 }
 0x1ba   : > { %p12_p3 = scmp.ge.s32.totalorder %s15_s14, 4   ;;  %s2484_s10 = smov %s1889_s11 }
 0x1bb   : > { %s2485_s11 = smov %s1972_s22  ;;  %s2486_s12 = smov %s1897_s13 }
 0x1bc   : > { %s2487_s13 = smov %s2489_s17  ;;  %14 = sbr.rel (!%p12_p3) target bundleno = 4 (0x4), region = 65 }
 0x1c1   :  { %1334 = vsyncpa [#allocation3], 1 }
 0x1c2   :  { %1336 = vsyncpa [#allocation3 + $0x1], 1 }

</bundles_post_ra>
